<compile_context>
chip_gen: v5e
topology: v5e:2x2
jax: 0.10.0
libtpu: 0.0.40
codegen_flags: <defaults>
</compile_context>

<pallas_src>
import jax
import jax.numpy as jnp
from jax.experimental import pallas as pl
from jax.experimental.pallas import tpu as pltpu


def _round_up(v, m):
    return ((v + m - 1) // m) * m


# Below this many rows, don't force a >=2-step grid (the v7x megacore split guard only
# matters when there is enough work for two TensorCores).
_SPLIT_MIN_ROWS = 2048


def _pick_tm(m, tm_target):
    """Row-tile size: as large as possible (amortize ~0.35us/step overhead), but keep the
    grid at >= 2 steps for large M so v7x's two TensorCores both get work."""
    if m >= _SPLIT_MIN_ROWS:
        tm = min(tm_target, _round_up(pl.cdiv(m, 2), 8))
    else:
        tm = min(tm_target, _round_up(m, 8))
    return max(8, _round_up(tm, 8))


def _pose_embedding_kernel(x_ref, w_ref, b_ref, o_ref):
    # x_ref: (TM, K)   w_ref: (K, N)   b_ref: (1, N) f32   o_ref: (TM, N)
    acc = jax.lax.dot_general(
        x_ref[...], w_ref[...],
        dimension_numbers=(((1,), (0,)), ((), ())),   # (TM,K) @ (K,N) -> (TM,N)
        preferred_element_type=jnp.float32,           # f32 accumulation on the MXU
    )
    o_ref[...] = (acc + b_ref[...]).astype(o_ref.dtype)


def make_pose_embedding(weight, bias, *, tm_target=4096, out_dtype=None,
                        param_dtype=None, min_pallas_rows=0):
    """
    Prepare parameters once (hoisted out of the per-call path) and return apply(x).

    weight: (embedding_size, input_size)  -- Conv1d weight squeezed over the kernel dim
    bias:   (embedding_size,)
    out_dtype:   output dtype (default: x.dtype). Pass bf16 to halve output HBM bytes.
    param_dtype: dtype for the resident weight (default: keep as given).
    min_pallas_rows: route M < this to a plain einsum (deployment-sized inputs).
    """
    weight = jnp.asarray(weight)
    bias = jnp.asarray(bias)
    N, K = weight.shape

    # Done ONCE at init: MXU-native RHS layout (K on sublanes, N on lanes).
    w_t = weight.T                       # (K, N)
    if param_dtype is not None:
        w_t = w_t.astype(param_dtype)
    b2 = bias.astype(jnp.float32).reshape(1, N)   # f32 bias add

    def apply(x):
        B, T, k_in = x.shape
        if k_in != K:
            raise ValueError(f"expected last dim {K}, got {k_in}")
        M = B * T
        odt = out_dtype if out_dtype is not None else x.dtype

        if M < min_pallas_rows:
            # Tiny-M path: a standalone pallas_call is pure launch overhead here.
            y = jnp.einsum("btk,kn->btn", x, w_t) + b2[0]
            return y.astype(odt)

        x2d = x.reshape(M, K)            # pure view: no cast, no pad, no extra HBM pass
        tm = _pick_tm(M, tm_target)
        grid = (pl.cdiv(M, tm),)         # ragged last block handled by Pallas

        cost = pl.CostEstimate(
            flops=2 * M * K * N,
            transcendentals=0,
            bytes_accessed=(x2d.size * x2d.dtype.itemsize
                            + w_t.size * w_t.dtype.itemsize
                            + b2.size * 4
                            + M * N * jnp.dtype(odt).itemsize),
        )

        out = pl.pallas_call(
            _pose_embedding_kernel,
            out_shape=jax.ShapeDtypeStruct((M, N), odt),
            grid=grid,
            in_specs=[
                pl.BlockSpec((tm, K), lambda i: (i, 0)),   # x tile marches over M
                pl.BlockSpec((K, N), lambda i: (0, 0)),    # weight VMEM-resident
                pl.BlockSpec((1, N), lambda i: (0, 0)),    # bias VMEM-resident (f32)
            ],
            out_specs=pl.BlockSpec((tm, N), lambda i: (i, 0)),   # true width: no slice pass
            compiler_params=pltpu.CompilerParams(
                dimension_semantics=("parallel",),          # shard M-tiles across v7x's 2 TCs
                vmem_limit_bytes=32 * 1024 * 1024,           # safe on v5e/v6e/v7x
            ),
            cost_estimate=cost,
        )(x2d, w_t, b2)

        return out.reshape(B, T, N)       # contiguous reshape: metadata only, no copy

    return apply


def pose_embedding(x, weight, bias, **kwargs):
    """One-shot convenience wrapper (for repeated calls use make_pose_embedding)."""
    return make_pose_embedding(weight, bias, **kwargs)(x)


if __name__ == "__main__":
    # Module config (defaults from the PyTorch module).
    input_size = 66
    embedding_size = 60
    B, T = 2, 8  # small batch of pose sequences

    key = jax.random.PRNGKey(0)
    kx, kw, kb, kx2 = jax.random.split(key, 4)

    # Deterministic synthetic parameters (Conv1d kernel_size=1 => weight (N, K)).
    weight = jax.random.normal(kw, (embedding_size, input_size), dtype=jnp.float32) * 0.05
    bias = jax.random.normal(kb, (embedding_size,), dtype=jnp.float32) * 0.05
    x = jax.random.normal(kx, (B, T, input_size), dtype=jnp.float32)

    # Reference (same math as the PyTorch module), full-precision.
    y_ref = jnp.einsum("btk,nk->btn", x, weight,
                       precision=jax.lax.Precision.HIGHEST) + bias

    apply_fn = make_pose_embedding(weight, bias)
    y = apply_fn(x)
    jax.block_until_ready(y)
    assert y.shape == (B, T, embedding_size)
    assert jnp.allclose(y, y_ref, atol=1e-2, rtol=1e-2)

    # Multi-tile + ragged-last-block path (grid > 1, M % TM != 0), still small data.
    B2, T2 = 2, 520
    x2 = jax.random.normal(kx2, (B2, T2, input_size), dtype=jnp.float32)
    y2_ref = jnp.einsum("btk,nk->btn", x2, weight,
                        precision=jax.lax.Precision.HIGHEST) + bias
    y2 = make_pose_embedding(weight, bias, tm_target=384)(x2)
    jax.block_until_ready(y2)
    assert y2.shape == (B2, T2, embedding_size)
    assert jnp.allclose(y2, y2_ref, atol=1e-2, rtol=1e-2)

    print("KERNEL_OK")
</pallas_src>

<mosaic_0001>
module attributes {stable_mosaic.version = 11 : i64} {
  func.func @_pose_embedding_kernel(%arg0: i32, %arg1: memref<16x66xf32, #tpu.memory_space<vmem>>, %arg2: memref<66x60xf32, #tpu.memory_space<vmem>>, %arg3: memref<1x60xf32, #tpu.memory_space<vmem>>, %arg4: memref<16x60xf32, #tpu.memory_space<vmem>>) attributes {dimension_semantics = [#tpu.dimension_semantics<parallel>], iteration_bounds = array<i64: 1>, scalar_prefetch = 0 : i64, scratch_operands = 0 : i64, tpu.core_type = #tpu.core_type<tc>, window_params = [{transform_indices = @transform_0, window_bounds = array<i64: 16, 66>}, {pipeline_mode = #tpu.pipeline_mode<synchronous>, transform_indices = @transform_1, window_bounds = array<i64: 66, 60>}, {pipeline_mode = #tpu.pipeline_mode<synchronous>, transform_indices = @transform_2, window_bounds = array<i64: 1, 60>}, {transform_indices = @transform_3, window_bounds = array<i64: 16, 60>}]} {
    %c0 = arith.constant 0 : index
    %c0_0 = arith.constant 0 : index
    %0 = vector.load %arg1[%c0, %c0_0] : memref<16x66xf32, #tpu.memory_space<vmem>>, vector<16x66xf32>
    %c0_1 = arith.constant 0 : index
    %c0_2 = arith.constant 0 : index
    %1 = vector.load %arg2[%c0_1, %c0_2] : memref<66x60xf32, #tpu.memory_space<vmem>>, vector<66x60xf32>
    %cst = arith.constant dense<0.000000e+00> : vector<16x60xf32>
    %2 = tpu.matmul %0, %1, %cst {dimension_numbers = #tpu.dot_dimension_numbers<[1], [0], [0], [1], [0, 0, 1, 1], [], []>} : vector<16x66xf32>, vector<66x60xf32>, vector<16x60xf32> -> vector<16x60xf32>
    %c0_3 = arith.constant 0 : index
    %c0_4 = arith.constant 0 : index
    %3 = vector.load %arg3[%c0_3, %c0_4] : memref<1x60xf32, #tpu.memory_space<vmem>>, vector<1x60xf32>
    %4 = vector.broadcast %3 : vector<1x60xf32> to vector<16x60xf32>
    %5 = arith.addf %2, %4 : vector<16x60xf32>
    %c0_5 = arith.constant 0 : index
    %c0_6 = arith.constant 0 : index
    %6 = vector.load %arg4[%c0_5, %c0_6] : memref<16x60xf32, #tpu.memory_space<vmem>>, vector<16x60xf32>
    tpu.vector_store %arg4[%c0_5, %c0_6], %5 {strides = array<i32>} : memref<16x60xf32, #tpu.memory_space<vmem>>, vector<16x60xf32>,
    return
  }
  func.func @transform_0(%arg0: i32) -> (i32, i32) {
    %c0_i32 = arith.constant 0 : i32
    %c0_i32_0 = arith.constant 0 : i32
    return %arg0, %c0_i32 : i32, i32
  }
  func.func @transform_1(%arg0: i32) -> (i32, i32) {
    %c0_i32 = arith.constant 0 : i32
    %c0_i32_0 = arith.constant 0 : i32
    %c0_i32_1 = arith.constant 0 : i32
    return %c0_i32, %c0_i32_0 : i32, i32
  }
  func.func @transform_2(%arg0: i32) -> (i32, i32) {
    %c0_i32 = arith.constant 0 : i32
    %c0_i32_0 = arith.constant 0 : i32
    %c0_i32_1 = arith.constant 0 : i32
    return %c0_i32, %c0_i32_0 : i32, i32
  }
  func.func @transform_3(%arg0: i32) -> (i32, i32) {
    %c0_i32 = arith.constant 0 : i32
    %c0_i32_0 = arith.constant 0 : i32
    return %arg0, %c0_i32 : i32, i32
  }
}

</mosaic_0001>

<bundles_post_ra>
// kernel: tpu_custom_call.1
= control target key start
LH: loop header
LB: loop body
LE: loop exit
PB: predicated region body
PF: predicated region fallthrough
CT: control target
= control target key end

     0   :  { %vm37_vm0 = vcmask 1041408   ;;  %s189_s0 = inlined_call_operand.vmem [shape: f32[16,66], index: 0, kind: input, shape index: {}]   ;;  %s190_s1 = inlined_call_operand.vmem [shape: f32[66,60], index: 1, kind: input, shape index: {}]   ;;  %s191_s2 = inlined_call_operand.vmem [shape: f32[1,60], index: 2, kind: input, shape index: {}]   ;;  %s192_s3 = inlined_call_operand.hbm [shape: f32[16,60], index: 3, kind: output, shape index: {}]  }
   0x1   :  { %v25_v0 = vld [vmem:[%s190_s1 + $0x40] sm:$0x3]  ;;  %v24_v1 = vld [vmem:[%s190_s1 + $0x38] sm:$0xff]  ;;  %v23_v2 = vld [vmem:[%s190_s1 + $0x30] sm:$0xff] }
   0x2   :  { %85 = vmatpush.msk.msra.mxu0 %vm37_vm0, %v25_v0  ;;  %88 = vmatpush.msk.msra.mxu1 %vm37_vm0, %v25_v0  ;;  %v22_v3 = vld [vmem:[%s190_s1 + $0x28] sm:$0xff] }
   0x4   :  { %49 = vmatpush.msra.mxu0 %v24_v1  ;;  %89 = vmatpush.msra.mxu1 %v24_v1 }
   0x5   :  { %8 = vsyncpa [#allocation3], 0  ;;  %v21_v4 = vld [vmem:[%s190_s1 + $0x20] sm:$0xff]  ;;  %v20_v5 = vld [vmem:[%s190_s1 + $0x18] sm:$0xff]  ;;  %vm30_vm1 = vcmask 539648   ;;  %s73_s12 = sshll.u32 %s192_s3, 4  ;;  %s74_s12 = int_to_ptr.hbm [resolvable:$true] %s73_s12 }
   0x6   :  { %50 = vmatpush.msra.mxu0 %v23_v2  ;;  %90 = vmatpush.msra.mxu1 %v23_v2  ;;  %v19_v6 = vld [vmem:[%s190_s1 + $0x10] sm:$0xff]  ;;  %v18_v7 = vld [vmem:[%s190_s1 + $0x8] sm:$0xff]  ;;  %v17_v8 = vld [vmem:[%s190_s1] sm:$0xff]  ;;  %s127_s1 = smov [#allocation2]   ;;  %vm64_vm2 = vcmask 490496   ;;  %s129_s13 = smov 8  }
   0x7   :  { %v15_v9 = vld [vmem:[%s189_s0] sm:$0xff]  ;;  %v16_v10 = vld [vmem:[%s189_s0 + $0x8] sm:$0xff]  ;;  %s71_s9 = sshll.u32 %s127_s1, 4  ;;  %s128_s0 = smov 128   ;;  %s72_s9 = int_to_ptr.vmem [resolvable:$true] %s71_s9 }
   0x8   :  { %51 = vmatpush.msra.mxu0 %v22_v3  ;;  %91 = vmatpush.msra.mxu1 %v22_v3  ;;  %v100_v11 = vld [vmem:[%s191_s2] ss:$0 sm:$0xff] }
   0xa   :  { %52 = vmatpush.msra.mxu0 %v21_v4  ;;  %92 = vmatpush.msra.mxu1 %v21_v4 }
   0xc   :  { %53 = vmatpush.msra.mxu0 %v20_v5  ;;  %93 = vmatpush.msra.mxu1 %v20_v5 }
   0xe   :  { %54 = vmatpush.msra.mxu0 %v19_v6  ;;  %94 = vmatpush.msra.mxu1 %v19_v6 }
  0x10   :  { %55 = vmatpush.msra.mxu0 %v18_v7  ;;  %95 = vmatpush.msra.mxu1 %v18_v7 }
  0x12   :  { %56 = vmatpush.msra.mxu0 %v17_v8  ;;  %96 = vmatpush.msra.mxu1 %v17_v8 }
  0x13   :  { %86 = vmatmul.msk.f32.vlgmr.msra.gmra.mxu0 %vm30_vm1, %v15_v9  ;;  %87 = vmatmul.msk.f32.vlgmr.msra.gmra.mxu1 %vm30_vm1, %v16_v10 }
  0x90   :  { %v58_v12 = vpop.f32.mrf.mxu0  ;;  %v61_v13 = vpop.f32.mrf.mxu1 }
  0x91   :  { %v59_v14 = vadd.f32 %v100_v11, %v58_v12  ;;  %v62_v15 = vadd.f32 %v100_v11, %v61_v13 }
  0x93   :  { %65 = vst.msk [vmem:[#allocation2] sm:$0xff] %vm64_vm2, %v59_v14 }
  0x94   :  { %66 = vst.msk [vmem:[#allocation2 + $0x8] sm:$0xff] %vm64_vm2, %v62_v15 }
  0x95   :  { %79 = dma.vmem_to_hbm [thread:$0]  %s72_s9, 256, %s74_s12, [#allocation3], %s128_s0, %s128_s0, %s129_s13  }
  0x96   :  { %125 = dma.done.wait [#allocation3], 256  }
  0x97   :  { %126 = vsyncadd [#allocation3], 4294967040 }
  0x98   :  { %84 = vsyncpa [#allocation3], 1 }

</bundles_post_ra>
